<compile_context>
chip_gen: v5e
topology: v5e:2x2
jax: 0.10.0
libtpu: 0.0.40
codegen_flags: <defaults>
</compile_context>

<pallas_src>
import numpy as np
import jax
import jax.numpy as jnp
from jax.experimental import pallas as pl
from jax.experimental.pallas import tpu as pltpu


def _round_up(x: int, m: int) -> int:
    return ((x + m - 1) // m) * m


def _pad_to(a, shape):
    """Zero-pad `a` up to `shape`; no extra HBM pass when already that shape."""
    if tuple(a.shape) == tuple(shape):
        return a
    pads = [(0, t - s) for s, t in zip(a.shape, shape)]
    return jnp.pad(a, pads)


def _spatial_tiles(M: int, N: int):
    """Lane-dense spatial tiles.  Big tiles (<=512) for the memory-bound
    regime; split the j axis when the grid would otherwise be a single block so
    both v7x TensorCores get work (neutral on single-TC v5e/v6e)."""
    tm = min(512, _round_up(M, 8))
    tn = min(512, _round_up(N, 128))
    if _round_up(M, 8) <= tm and _round_up(N, 128) <= tn and tn > 128:
        tn = max(128, _round_up(tn // 2, 128))
    return tm, tn


# -------------------------- rank-1 fast-path kernel --------------------------
def _rank1_kernel(u_ref, v_ref, o_ref):
    # (tm, 1) * (1, tn) broadcast outer product on the VPU: no MXU, no K axis.
    o_ref[...] = (u_ref[...] * v_ref[...]).astype(o_ref.dtype)


def _rank1_outer_pallas(u_col, v_row, out_dtype):
    M = u_col.shape[0]
    N = v_row.shape[1]
    tm, tn = _spatial_tiles(M, N)
    Mp, Np = _round_up(M, tm), _round_up(N, tn)

    u_p = _pad_to(u_col.astype(jnp.float32), (Mp, 1))
    v_p = _pad_to(v_row.astype(jnp.float32), (1, Np))

    out = pl.pallas_call(
        _rank1_kernel,
        out_shape=jax.ShapeDtypeStruct((Mp, Np), out_dtype),
        grid=(Mp // tm, Np // tn),
        in_specs=[pl.BlockSpec((tm, 1), lambda i, j: (i, 0)),
                  pl.BlockSpec((1, tn), lambda i, j: (0, j))],
        out_specs=pl.BlockSpec((tm, tn), lambda i, j: (i, j)),
        compiler_params=pltpu.CompilerParams(
            dimension_semantics=("parallel", "parallel")),
    )(u_p, v_p)
    return out[:M, :N]


# ---------------------- general (dynamic-rank) kernel ------------------------
def _svd_recon_kernel(nk_ref, u_hbm, vt_hbm, o_ref, ubuf, vbuf, sem, acc_ref):
    # nk_ref:  (1,)       SMEM scalar: number of live K blocks (ceil(k / tk))
    # u_hbm:   (Mp, Rp)   HBM (memory_space=ANY), left singular vectors
    # vt_hbm:  (Rp, Np)   HBM, sigma already folded in (rows >= k are zero)
    # o_ref:   (tm, tn)   output tile (auto-pipelined)
    # ubuf:    (2,tm,tk)  VMEM double buffer for U
    # vbuf:    (2,tk,tn)  VMEM double buffer for sigma*V^T
    # sem:     (2, 2)     DMA semaphores
    # acc_ref: (tm, tn)   f32 accumulator
    i = pl.program_id(0)
    j = pl.program_id(1)
    nk = nk_ref[0]
    _, tm, tk = ubuf.shape
    tn = vbuf.shape[2]

    def fetch(kb, slot):
        k0 = pl.multiple_of(kb * tk, tk)
        pltpu.make_async_copy(
            u_hbm.at[pl.ds(i * tm, tm), pl.ds(k0, tk)],
            ubuf.at[slot], sem.at[0, slot]).start()
        pltpu.make_async_copy(
            vt_hbm.at[pl.ds(k0, tk), pl.ds(j * tn, tn)],
            vbuf.at[slot], sem.at[1, slot]).start()

    fetch(0, 0)                       # prime the pipeline (nk >= 1 always)
    acc_ref[...] = jnp.zeros_like(acc_ref)

    # Only live K blocks are iterated: no dead grid steps, no dead DMA traffic.
    @pl.loop(0, nk)
    def _(kb):
        slot = kb & 1
        pltpu.make_async_copy(u_hbm.at[pl.ds(0, tm), pl.ds(0, tk)],
                              ubuf.at[slot], sem.at[0, slot]).wait()
        pltpu.make_async_copy(vt_hbm.at[pl.ds(0, tk), pl.ds(0, tn)],
                              vbuf.at[slot], sem.at[1, slot]).wait()

        @pl.when(kb + 1 < nk)
        def _prefetch_next():
            fetch(kb + 1, 1 - slot)

        acc_ref[...] += jnp.dot(ubuf[slot], vbuf[slot],
                                preferred_element_type=jnp.float32)   # MXU

    o_ref[...] = acc_ref[...].astype(o_ref.dtype)


def _svd_reconstruct_pallas(u, vts, k, out_dtype, *, tk=128):
    M, R = u.shape
    Rv, N = vts.shape
    assert R == Rv

    tm, tn = _spatial_tiles(M, N)
    Mp, Np, Rp = _round_up(M, tm), _round_up(N, tn), _round_up(R, tk)
    nk_total = Rp // tk

    u_p = _pad_to(u, (Mp, Rp))
    vt_p = _pad_to(vts, (Rp, Np))

    # Number of live K blocks (rows of vts with index >= k are exactly zero, so
    # skipping the remaining blocks is lossless).
    k = jnp.asarray(k, jnp.int32)
    nk = jnp.clip((k + tk - 1) // tk, 1, nk_total).astype(jnp.int32)
    nk_arr = nk.reshape(1)

    out = pl.pallas_call(
        _svd_recon_kernel,
        out_shape=jax.ShapeDtypeStruct((Mp, Np), out_dtype),
        grid_spec=pltpu.PrefetchScalarGridSpec(
            num_scalar_prefetch=1,
            grid=(Mp // tm, Np // tn),
            in_specs=[pl.BlockSpec(memory_space=pl.ANY),
                      pl.BlockSpec(memory_space=pl.ANY)],
            out_specs=pl.BlockSpec((tm, tn), lambda i, j, nk_s: (i, j)),
            scratch_shapes=[
                pltpu.VMEM((2, tm, tk), u_p.dtype),
                pltpu.VMEM((2, tk, tn), vt_p.dtype),
                pltpu.SemaphoreType.DMA((2, 2)),
                pltpu.VMEM((tm, tn), jnp.float32),
            ]),
        compiler_params=pltpu.CompilerParams(
            dimension_semantics=("parallel", "parallel")),
    )(nk_arr, u_p, vt_p)
    return out[:M, :N]


# ------------------------------ Module wrapper -------------------------------
class SVDFilter:
    """SVD low-rank denoising (matches the PyTorch SVDFilter forward)."""

    def __init__(self, use_energy=False, threshold=0.9):
        self.use_energy = use_energy
        self.threshold = threshold

    def __call__(self, x):
        out_dtype = x.dtype
        # TODO(synk): the SVD factorization itself (iterative LAPACK-style
        # routine) has no clean Pallas equivalent; it runs in plain JAX in f32.
        xf = x.astype(jnp.float32)
        u, sigma, vt = jnp.linalg.svd(xf, full_matrices=False)

        if (not self.use_energy) and self.threshold <= 1.0:
            # sigma is sorted descending so diff(sigma) <= 0 < 1 - threshold
            # and k == 1 deterministically (bug-compatible with PyTorch).
            # Rank-1 fast path: fold sigma[0] into the V^T row in f32 and do a
            # pure VPU outer product.
            u_col = u[:, :1]                       # (M, 1)
            v_row = sigma[0] * vt[:1, :]           # (1, N), f32
            return _rank1_outer_pallas(u_col, v_row, out_dtype)

        # General / dynamic-rank path (energy mode or threshold > 1).
        if self.use_energy:
            total = jnp.sum(sigma)
            cumulative = jnp.cumsum(sigma)
            k = jnp.argmax(cumulative >= self.threshold * total) + 1
        else:
            diffs = jnp.diff(sigma)
            k = jnp.sum(diffs > (1.0 - self.threshold)) + 1

        r = sigma.shape[0]
        mask = (jnp.arange(r) < k).astype(sigma.dtype)
        # Fold the masked singular values into V^T once, in f32, *before* any
        # downcast: removes the per-tile scale and improves bf16 precision.
        vts = vt * (sigma * mask)[:, None]

        # bf16 inputs -> bf16 MXU operands (f32 accumulation in-kernel).
        # f32 inputs stay f32 for accuracy (rank k is small, so the general
        # path is memory-bound, not MXU-bound).
        op_dtype = jnp.bfloat16 if out_dtype == jnp.bfloat16 else jnp.float32
        return _svd_reconstruct_pallas(u.astype(op_dtype),
                                       vts.astype(op_dtype), k, out_dtype)


# ----------------------------------- Main ------------------------------------
if __name__ == "__main__":
    key = jax.random.PRNGKey(0)
    M, N = 16, 16
    x = jax.random.normal(key, (M, N), dtype=jnp.float32)

    u, sigma, vt = jnp.linalg.svd(x, full_matrices=False)

    # --- default mode: rank-1 fast path (k == 1) ------------------------------
    model = SVDFilter(use_energy=False, threshold=0.9)
    y = jax.block_until_ready(model(x))
    ref1 = u[:, :1] * (sigma[0] * vt[:1, :])
    assert y.shape == (M, N) and y.dtype == x.dtype
    assert jnp.allclose(y, ref1, atol=1e-5, rtol=1e-5)

    # --- energy mode: dynamic-rank manual-DMA MXU kernel ----------------------
    model_e = SVDFilter(use_energy=True, threshold=0.9)
    ye = jax.block_until_ready(model_e(x))

    k = jnp.argmax(jnp.cumsum(sigma) >= 0.9 * jnp.sum(sigma)) + 1
    mask = (jnp.arange(sigma.shape[0]) < k).astype(sigma.dtype)
    ref_e = (np.asarray(u, np.float64)
             @ np.diag(np.asarray(sigma * mask, np.float64))
             @ np.asarray(vt, np.float64))
    assert ye.shape == (M, N) and ye.dtype == x.dtype
    # Loose tolerance: the MXU f32 matmul path may use reduced-precision passes.
    assert jnp.allclose(ye, ref_e.astype(np.float32), atol=5e-2, rtol=5e-2)

    print("KERNEL_OK")
</pallas_src>

<mosaic_0001>
module attributes {stable_mosaic.version = 11 : i64} {
  func.func @_rank1_kernel(%arg0: i32, %arg1: i32, %arg2: memref<16x1xf32, #tpu.memory_space<vmem>>, %arg3: memref<1x128xf32, #tpu.memory_space<vmem>>, %arg4: memref<16x128xf32, #tpu.memory_space<vmem>>) attributes {dimension_semantics = [#tpu.dimension_semantics<parallel>, #tpu.dimension_semantics<parallel>], iteration_bounds = array<i64: 1, 1>, scalar_prefetch = 0 : i64, scratch_operands = 0 : i64, tpu.core_type = #tpu.core_type<tc>, window_params = [{transform_indices = @transform_0, window_bounds = array<i64: 16, 1>}, {transform_indices = @transform_1, window_bounds = array<i64: 1, 128>}, {transform_indices = @transform_2, window_bounds = array<i64: 16, 128>}]} {
    %c0 = arith.constant 0 : index
    %c0_0 = arith.constant 0 : index
    %0 = vector.load %arg2[%c0, %c0_0] : memref<16x1xf32, #tpu.memory_space<vmem>>, vector<16x1xf32>
    %c0_1 = arith.constant 0 : index
    %c0_2 = arith.constant 0 : index
    %1 = vector.load %arg3[%c0_1, %c0_2] : memref<1x128xf32, #tpu.memory_space<vmem>>, vector<1x128xf32>
    %2 = vector.broadcast %0 : vector<16x1xf32> to vector<16x128xf32>
    %3 = vector.broadcast %1 : vector<1x128xf32> to vector<16x128xf32>
    %4 = arith.mulf %2, %3 : vector<16x128xf32>
    %c0_3 = arith.constant 0 : index
    %c0_4 = arith.constant 0 : index
    %5 = vector.load %arg4[%c0_3, %c0_4] : memref<16x128xf32, #tpu.memory_space<vmem>>, vector<16x128xf32>
    tpu.vector_store %arg4[%c0_3, %c0_4], %4 {strides = array<i32>} : memref<16x128xf32, #tpu.memory_space<vmem>>, vector<16x128xf32>,
    return
  }
  func.func @transform_0(%arg0: i32, %arg1: i32) -> (i32, i32) {
    %c0_i32 = arith.constant 0 : i32
    %c0_i32_0 = arith.constant 0 : i32
    return %arg0, %c0_i32 : i32, i32
  }
  func.func @transform_1(%arg0: i32, %arg1: i32) -> (i32, i32) {
    %c0_i32 = arith.constant 0 : i32
    %c0_i32_0 = arith.constant 0 : i32
    return %c0_i32, %arg1 : i32, i32
  }
  func.func @transform_2(%arg0: i32, %arg1: i32) -> (i32, i32) {
    %c0_i32 = arith.constant 0 : i32
    return %arg0, %arg1 : i32, i32
  }
}

</mosaic_0001>

<bundles_post_ra>
// kernel: tpu_custom_call.1
= control target key start
LH: loop header
LB: loop body
LE: loop exit
PB: predicated region body
PF: predicated region fallthrough
CT: control target
= control target key end

     0   :  { %v82_v1 = vmov 0   ;;  %s113_s0 = inlined_call_operand.vmem [shape: f32[16,1], index: 0, kind: input, shape index: {}]   ;;  %s114_s1 = inlined_call_operand.vmem [shape: f32[1,128], index: 1, kind: input, shape index: {}]   ;;  %s115_s2 = inlined_call_operand.hbm [shape: f32[16,128], index: 2, kind: output, shape index: {}]  }
   0x1   :  { %v12_v0 = vld [vmem:[%s113_s0] sm:$0xff]  ;;  %54 = vset.pattern.permute.xlu0 %v82_v1 }
   0x2   :  { %7 = vsyncpa [#allocation3], 0  ;;  %17 = vperm.xlu0 %54, %v12_v0   ;;  %v13_v2 = vld [vmem:[%s113_s0 + $0x8] sm:$0xff]  ;;  %v55_v3 = vld [vmem:[%s114_s1] ss:$0 sm:$0xff]  ;;  %s83_s15 = smov [#allocation2]  }
   0x3   :  { %s36_s16 = sshll.u32 %s83_s15, 4  ;;  %s38_s19 = sshll.u32 %s115_s2, 4  ;;  %s37_s16 = int_to_ptr.vmem [resolvable:$true] %s36_s16  ;;  %s39_s19 = int_to_ptr.hbm [resolvable:$true] %s38_s19 }
   0x4   :  { %s84_s0 = smov 128   ;;  %s85_s20 = smov 8  }
   0xa   :  { %22 = vperm.xlu0 %54, %v13_v2  }
  0x74   :  { %v18_v4 = vpop.permute.xlu0 %17 }
  0x75   :  { %v28_v5 = vmul.f32 %v55_v3, %v18_v4 }
  0x77   :  { %30 = vst [vmem:[#allocation2] sm:$0xff] %v28_v5 }
  0x7c   :  { %v23_v6 = vpop.permute.xlu0 %22 }
  0x7d   :  { %v29_v7 = vmul.f32 %v55_v3, %v23_v6 }
  0x7f   :  { %31 = vst [vmem:[#allocation2 + $0x8] sm:$0xff] %v29_v7 }
  0x80   :  { %44 = dma.vmem_to_hbm [thread:$0]  %s37_s16, 256, %s39_s19, [#allocation3], %s84_s0, %s84_s0, %s85_s20  }
  0x81   :  { %80 = dma.done.wait [#allocation3], 256  }
  0x82   :  { %81 = vsyncadd [#allocation3], 4294967040 }
  0x83   :  { %49 = vsyncpa [#allocation3], 1 }

</bundles_post_ra>
